<compile_context>
chip_gen: v7x
topology: tpu7x:2x2x1
jax: 0.10.0
libtpu: 0.0.40
codegen_flags: <defaults>
</compile_context>

<pallas_src>
import math

import jax
import jax.numpy as jnp
from jax.experimental import pallas as pl
from jax.experimental.pallas import tpu as pltpu


_INV_SQRT2 = 0.7071067811865476


def _erf_approx(x):
    # Abramowitz & Stegun 7.1.26 rational approximation, |err| <= 1.5e-7.
    a1, a2, a3, a4, a5 = (0.254829592, -0.284496736, 1.421413741,
                          -1.453152027, 1.061405429)
    p = 0.3275911
    ax = jnp.abs(x)
    t = 1.0 / (1.0 + p * ax)
    poly = ((((a5 * t + a4) * t + a3) * t + a2) * t + a1) * t
    y = 1.0 - poly * jnp.exp(-ax * ax)
    return jnp.where(x >= 0, y, -y)


def _gelu_exact(x):
    # Exact (erf-based) GELU, matching torch.nn.functional.gelu's default.
    return 0.5 * x * (1.0 + _erf_approx(x * _INV_SQRT2))


def expert_kernel(x_ref, w1_ref, b1_ref, w2_ref, b2_ref, o_ref, acc_ref):
    k = pl.program_id(1)

    @pl.when(k == 0)
    def _():
        acc_ref[...] = jnp.zeros_like(acc_ref)

    x = x_ref[...]                                             # [tm, E]
    # fc1 (hidden slice) + exact GELU; intermediate stays on-chip.
    h = jnp.dot(x, w1_ref[...],
                preferred_element_type=jnp.float32,
                precision=jax.lax.Precision.HIGHEST) + b1_ref[...]   # [tm, th]
    h = _gelu_exact(h)

    # fc2 partial product accumulated over hidden tiles.
    acc_ref[...] += jnp.dot(h, w2_ref[...],
                            preferred_element_type=jnp.float32,
                            precision=jax.lax.Precision.HIGHEST)     # [tm, E]

    @pl.when(k == pl.num_programs(1) - 1)
    def _():
        o_ref[...] = (acc_ref[...] + b2_ref[...]).astype(o_ref.dtype)


def _round_up(x, m):
    return (x + m - 1) // m * m


def _pick_hidden_tile(e, h):
    """Largest hidden tile whose double-buffered W1/W2 slices fit a VMEM budget."""
    budget = 16 * 1024 * 1024  # bytes for (W1 slice + W2 slice) x 2 buffers, f32
    best = h
    for th in (4096, 2048, 1024, 512, 256, 128):
        if h % th == 0:
            best = th
            if 4 * e * th * 4 <= budget:
                return th
    return best


def expert_forward(x, w1, b1, w2, b2, *, row_tile=256):
    """x: [B, T, E]; w1: [E, 4E]; b1: [1, 4E]; w2: [4E, E]; b2: [1, E] -> [B, T, E]."""
    B, T, E = x.shape
    H = w1.shape[1]
    M = B * T

    x2 = x.reshape(M, E)                       # row-packed, lane-dense slab
    tm = min(row_tile, _round_up(M, 8))        # sublane-aligned row tile
    Mp = _round_up(M, tm)
    if Mp != M:
        x2 = jnp.pad(x2, ((0, Mp - M), (0, 0)))

    th = _pick_hidden_tile(E, H)
    grid = (Mp // tm, H // th)

    out = pl.pallas_call(
        expert_kernel,
        out_shape=jax.ShapeDtypeStruct((Mp, E), x.dtype),
        grid_spec=pltpu.PrefetchScalarGridSpec(
            num_scalar_prefetch=0,
            grid=grid,
            in_specs=[
                pl.BlockSpec((tm, E), lambda i, k: (i, 0)),   # x rows (same across k -> no re-DMA)
                pl.BlockSpec((E, th), lambda i, k: (0, k)),   # W1 hidden slice
                pl.BlockSpec((1, th), lambda i, k: (0, k)),   # b1 hidden slice
                pl.BlockSpec((th, E), lambda i, k: (k, 0)),   # W2 hidden slice
                pl.BlockSpec((1, E), lambda i, k: (0, 0)),    # b2 (constant)
            ],
            out_specs=pl.BlockSpec((tm, E), lambda i, k: (i, 0)),
            scratch_shapes=[pltpu.VMEM((tm, E), jnp.float32)],
        ),
        compiler_params=pltpu.CompilerParams(
            dimension_semantics=("parallel", "arbitrary"),
        ),
    )(x2, w1, b1, w2, b2)

    if Mp != M:
        out = out[:M]
    return out.reshape(B, T, E)


def expert_ref(x, w1, b1, w2, b2):
    h = jnp.dot(x.reshape(-1, x.shape[-1]), w1,
                precision=jax.lax.Precision.HIGHEST) + b1[0]
    h = jax.nn.gelu(h, approximate=False)
    o = jnp.dot(h, w2, precision=jax.lax.Precision.HIGHEST) + b2[0]
    return o.reshape(x.shape[:-1] + (w2.shape[1],))


if __name__ == "__main__":
    B, T, E = 2, 8, 32               # batch, seq, embed_size
    H = 4 * E                        # hidden = 4 * embed_size

    key = jax.random.PRNGKey(0)
    kx, kw1, kb1, kw2, kb2 = jax.random.split(key, 5)

    x = jax.random.normal(kx, (B, T, E), dtype=jnp.float32)

    # nn.Linear-style uniform init; weights stored [in, out] so y = x @ W + b.
    bound1 = 1.0 / math.sqrt(E)
    w1 = jax.random.uniform(kw1, (E, H), jnp.float32, -bound1, bound1)
    b1 = jax.random.uniform(kb1, (1, H), jnp.float32, -bound1, bound1)
    bound2 = 1.0 / math.sqrt(H)
    w2 = jax.random.uniform(kw2, (H, E), jnp.float32, -bound2, bound2)
    b2 = jax.random.uniform(kb2, (1, E), jnp.float32, -bound2, bound2)

    out = expert_forward(x, w1, b1, w2, b2)
    out = jax.block_until_ready(out)

    ref = expert_ref(x, w1, b1, w2, b2)
    assert out.shape == (B, T, E)
    assert jnp.allclose(out, ref, atol=1e-4, rtol=1e-4), "mismatch vs reference"

    print("KERNEL_OK")
</pallas_src>

<mosaic_0001>
module attributes {stable_mosaic.version = 11 : i64} {
  func.func @expert_kernel(%arg0: i32, %arg1: i32, %arg2: memref<16x32xf32, #tpu.memory_space<vmem>>, %arg3: memref<32x128xf32, #tpu.memory_space<vmem>>, %arg4: memref<1x128xf32, #tpu.memory_space<vmem>>, %arg5: memref<128x32xf32, #tpu.memory_space<vmem>>, %arg6: memref<1x32xf32, #tpu.memory_space<vmem>>, %arg7: memref<16x32xf32, #tpu.memory_space<vmem>>, %arg8: memref<16x32xf32, #tpu.memory_space<vmem>>) attributes {dimension_semantics = [#tpu.dimension_semantics<parallel>, #tpu.dimension_semantics<arbitrary>], iteration_bounds = array<i64: 1, 1>, scalar_prefetch = 0 : i64, scratch_operands = 1 : i64, tpu.core_type = #tpu.core_type<tc>, window_params = [{transform_indices = @transform_0, window_bounds = array<i64: 16, 32>}, {transform_indices = @transform_1, window_bounds = array<i64: 32, 128>}, {transform_indices = @transform_2, window_bounds = array<i64: 1, 128>}, {transform_indices = @transform_3, window_bounds = array<i64: 128, 32>}, {pipeline_mode = #tpu.pipeline_mode<synchronous>, transform_indices = @transform_4, window_bounds = array<i64: 1, 32>}, {transform_indices = @transform_5, window_bounds = array<i64: 16, 32>}]} {
    %c0_i32 = arith.constant 0 : i32
    %0 = arith.cmpi eq, %arg1, %c0_i32 : i32
    %1 = arith.extui %0 : i1 to i32
    %c0_i32_0 = arith.constant 0 : i32
    %2 = arith.cmpi ne, %1, %c0_i32_0 : i32
    scf.if %2 {
      %cst_30 = arith.constant 0.000000e+00 : f32
      %57 = vector.broadcast %cst_30 : f32 to vector<16x32xf32>
      %c0_31 = arith.constant 0 : index
      %c0_32 = arith.constant 0 : index
      %58 = vector.load %arg8[%c0_31, %c0_32] : memref<16x32xf32, #tpu.memory_space<vmem>>, vector<16x32xf32>
      tpu.vector_store %arg8[%c0_31, %c0_32], %57 {strides = array<i32>} : memref<16x32xf32, #tpu.memory_space<vmem>>, vector<16x32xf32>,
    } else {
    }
    %c0 = arith.constant 0 : index
    %c0_1 = arith.constant 0 : index
    %3 = vector.load %arg2[%c0, %c0_1] : memref<16x32xf32, #tpu.memory_space<vmem>>, vector<16x32xf32>
    %c0_2 = arith.constant 0 : index
    %c0_3 = arith.constant 0 : index
    %4 = vector.load %arg3[%c0_2, %c0_3] : memref<32x128xf32, #tpu.memory_space<vmem>>, vector<32x128xf32>
    %cst = arith.constant dense<0.000000e+00> : vector<16x128xf32>
    %5 = tpu.matmul %3, %4, %cst {dimension_numbers = #tpu.dot_dimension_numbers<[1], [0], [0], [1], [0, 0, 1, 1], [], []>, precision = #tpu.contract_precision<fp32>} : vector<16x32xf32>, vector<32x128xf32>, vector<16x128xf32> -> vector<16x128xf32>
    %c0_4 = arith.constant 0 : index
    %c0_5 = arith.constant 0 : index
    %6 = vector.load %arg4[%c0_4, %c0_5] : memref<1x128xf32, #tpu.memory_space<vmem>>, vector<1x128xf32>
    %7 = vector.broadcast %6 : vector<1x128xf32> to vector<16x128xf32>
    %8 = arith.addf %5, %7 : vector<16x128xf32>
    %cst_6 = arith.constant 5.000000e-01 : f32
    %9 = vector.broadcast %cst_6 : f32 to vector<16x128xf32>
    %10 = arith.mulf %9, %8 : vector<16x128xf32>
    %cst_7 = arith.constant 0.707106769 : f32
    %11 = vector.broadcast %cst_7 : f32 to vector<16x128xf32>
    %12 = arith.mulf %8, %11 : vector<16x128xf32>
    %13 = math.absf %12 : vector<16x128xf32>
    %cst_8 = arith.constant 0.327591091 : f32
    %14 = vector.broadcast %cst_8 : f32 to vector<16x128xf32>
    %15 = arith.mulf %14, %13 : vector<16x128xf32>
    %cst_9 = arith.constant 1.000000e+00 : f32
    %16 = vector.broadcast %cst_9 : f32 to vector<16x128xf32>
    %17 = arith.addf %16, %15 : vector<16x128xf32>
    %cst_10 = arith.constant 1.000000e+00 : f32
    %18 = vector.broadcast %cst_10 : f32 to vector<16x128xf32>
    %19 = arith.divf %18, %17 : vector<16x128xf32>
    %cst_11 = arith.constant 1.06140542 : f32
    %20 = vector.broadcast %cst_11 : f32 to vector<16x128xf32>
    %21 = arith.mulf %20, %19 : vector<16x128xf32>
    %cst_12 = arith.constant -1.45315206 : f32
    %22 = vector.broadcast %cst_12 : f32 to vector<16x128xf32>
    %23 = arith.addf %21, %22 : vector<16x128xf32>
    %24 = arith.mulf %23, %19 : vector<16x128xf32>
    %cst_13 = arith.constant 1.42141378 : f32
    %25 = vector.broadcast %cst_13 : f32 to vector<16x128xf32>
    %26 = arith.addf %24, %25 : vector<16x128xf32>
    %27 = arith.mulf %26, %19 : vector<16x128xf32>
    %cst_14 = arith.constant -0.284496725 : f32
    %28 = vector.broadcast %cst_14 : f32 to vector<16x128xf32>
    %29 = arith.addf %27, %28 : vector<16x128xf32>
    %30 = arith.mulf %29, %19 : vector<16x128xf32>
    %cst_15 = arith.constant 0.254829586 : f32
    %31 = vector.broadcast %cst_15 : f32 to vector<16x128xf32>
    %32 = arith.addf %30, %31 : vector<16x128xf32>
    %33 = arith.mulf %32, %19 : vector<16x128xf32>
    %cst_16 = arith.constant 0.000000e+00 : f32
    %34 = vector.broadcast %cst_16 : f32 to vector<16x128xf32>
    %35 = arith.subf %34, %13 : vector<16x128xf32>
    %36 = arith.mulf %35, %13 : vector<16x128xf32>
    %37 = math.exp %36 : vector<16x128xf32>
    %38 = arith.mulf %33, %37 : vector<16x128xf32>
    %cst_17 = arith.constant 1.000000e+00 : f32
    %39 = vector.broadcast %cst_17 : f32 to vector<16x128xf32>
    %40 = arith.subf %39, %38 : vector<16x128xf32>
    %cst_18 = arith.constant 0.000000e+00 : f32
    %41 = vector.broadcast %cst_18 : f32 to vector<16x128xf32>
    %42 = arith.cmpf oge, %12, %41 : vector<16x128xf32>
    %cst_19 = arith.constant 0.000000e+00 : f32
    %43 = vector.broadcast %cst_19 : f32 to vector<16x128xf32>
    %44 = arith.subf %43, %40 : vector<16x128xf32>
    %45 = arith.select %42, %40, %44 : vector<16x128xi1>, vector<16x128xf32>
    %cst_20 = arith.constant 1.000000e+00 : f32
    %46 = vector.broadcast %cst_20 : f32 to vector<16x128xf32>
    %47 = arith.addf %46, %45 : vector<16x128xf32>
    %48 = arith.mulf %10, %47 : vector<16x128xf32>
    %c0_21 = arith.constant 0 : index
    %c0_22 = arith.constant 0 : index
    %49 = vector.load %arg8[%c0_21, %c0_22] : memref<16x32xf32, #tpu.memory_space<vmem>>, vector<16x32xf32>
    %c0_23 = arith.constant 0 : index
    %c0_24 = arith.constant 0 : index
    %50 = vector.load %arg5[%c0_23, %c0_24] : memref<128x32xf32, #tpu.memory_space<vmem>>, vector<128x32xf32>
    %cst_25 = arith.constant dense<0.000000e+00> : vector<16x32xf32>
    %51 = tpu.matmul %48, %50, %cst_25 {dimension_numbers = #tpu.dot_dimension_numbers<[1], [0], [0], [1], [0, 0, 1, 1], [], []>, precision = #tpu.contract_precision<fp32>} : vector<16x128xf32>, vector<128x32xf32>, vector<16x32xf32> -> vector<16x32xf32>
    %52 = arith.addf %49, %51 : vector<16x32xf32>
    %c0_26 = arith.constant 0 : index
    %c0_27 = arith.constant 0 : index
    %53 = vector.load %arg8[%c0_26, %c0_27] : memref<16x32xf32, #tpu.memory_space<vmem>>, vector<16x32xf32>
    tpu.vector_store %arg8[%c0_26, %c0_27], %52 {strides = array<i32>} : memref<16x32xf32, #tpu.memory_space<vmem>>, vector<16x32xf32>,
    %c0_i32_28 = arith.constant 0 : i32
    %54 = arith.cmpi eq, %arg1, %c0_i32_28 : i32
    %55 = arith.extui %54 : i1 to i32
    %c0_i32_29 = arith.constant 0 : i32
    %56 = arith.cmpi ne, %55, %c0_i32_29 : i32
    scf.if %56 {
      %c0_30 = arith.constant 0 : index
      %c0_31 = arith.constant 0 : index
      %57 = vector.load %arg8[%c0_30, %c0_31] : memref<16x32xf32, #tpu.memory_space<vmem>>, vector<16x32xf32>
      %c0_32 = arith.constant 0 : index
      %c0_33 = arith.constant 0 : index
      %58 = vector.load %arg6[%c0_32, %c0_33] : memref<1x32xf32, #tpu.memory_space<vmem>>, vector<1x32xf32>
      %59 = vector.broadcast %58 : vector<1x32xf32> to vector<16x32xf32>
      %60 = arith.addf %57, %59 : vector<16x32xf32>
      %c0_34 = arith.constant 0 : index
      %c0_35 = arith.constant 0 : index
      %61 = vector.load %arg7[%c0_34, %c0_35] : memref<16x32xf32, #tpu.memory_space<vmem>>, vector<16x32xf32>
      tpu.vector_store %arg7[%c0_34, %c0_35], %60 {strides = array<i32>} : memref<16x32xf32, #tpu.memory_space<vmem>>, vector<16x32xf32>,
    } else {
    }
    return
  }
  func.func @transform_0(%arg0: i32, %arg1: i32) -> (i32, i32) {
    %c0_i32 = arith.constant 0 : i32
    %c0_i32_0 = arith.constant 0 : i32
    return %arg0, %c0_i32 : i32, i32
  }
  func.func @transform_1(%arg0: i32, %arg1: i32) -> (i32, i32) {
    %c0_i32 = arith.constant 0 : i32
    %c0_i32_0 = arith.constant 0 : i32
    return %c0_i32, %arg1 : i32, i32
  }
  func.func @transform_2(%arg0: i32, %arg1: i32) -> (i32, i32) {
    %c0_i32 = arith.constant 0 : i32
    %c0_i32_0 = arith.constant 0 : i32
    return %c0_i32, %arg1 : i32, i32
  }
  func.func @transform_3(%arg0: i32, %arg1: i32) -> (i32, i32) {
    %c0_i32 = arith.constant 0 : i32
    %c0_i32_0 = arith.constant 0 : i32
    return %arg1, %c0_i32 : i32, i32
  }
  func.func @transform_4(%arg0: i32, %arg1: i32) -> (i32, i32) {
    %c0_i32 = arith.constant 0 : i32
    %c0_i32_0 = arith.constant 0 : i32
    %c0_i32_1 = arith.constant 0 : i32
    return %c0_i32, %c0_i32_0 : i32, i32
  }
  func.func @transform_5(%arg0: i32, %arg1: i32) -> (i32, i32) {
    %c0_i32 = arith.constant 0 : i32
    %c0_i32_0 = arith.constant 0 : i32
    return %arg0, %c0_i32 : i32, i32
  }
}

</mosaic_0001>

<bundles_post_ra>
// kernel: tpu_custom_call.1
= control target key start
LH: loop header
LB: loop body
LE: loop exit
PB: predicated region body
PF: predicated region fallthrough
CT: control target
= control target key end

     0   :  { %vm25_vm0 = vcmask 261120   ;;  %s2462_s0 = inlined_call_operand.vmem [shape: f32[16,32], index: 0, kind: input, shape index: {}]   ;;  %s2463_s1 = inlined_call_operand.vmem [shape: f32[32,128], index: 1, kind: input, shape index: {}]   ;;  %s2464_s2 = inlined_call_operand.vmem [shape: f32[1,128], index: 2, kind: input, shape index: {}]   ;;  %s2465_s3 = inlined_call_operand.vmem [shape: f32[128,32], index: 3, kind: input, shape index: {}]   ;;  %s2466_s4 = inlined_call_operand.vmem [shape: f32[1,32], index: 4, kind: input, shape index: {}]   ;;  %s2467_s5 = inlined_call_operand.hbm [shape: f32[16,32], index: 5, kind: output, shape index: {}]  }
   0x1   :  { %v30_v0 = vld [vmem:[%s2463_s1] sm:$0xff]  ;;  %v31_v1 = vld [vmem:[%s2463_s1 + $0x8] sm:$0xff]  ;;  %v32_v2 = vld [vmem:[%s2463_s1 + $0x10] sm:$0xff] }
   0x2   :  { %v49_v3 = vand.u32 4294901760, %v30_v0  ;;  %v52_v4 = vand.u32 4294901760, %v31_v1  ;;  %v33_v5 = vld [vmem:[%s2463_s1 + $0x18] sm:$0xff]  ;;  %v55_v6 = vand.u32 4294901760, %v32_v2  ;;  %v28_v7 = vld [vmem:[%s2462_s0] sm:$0xff]  ;;  %v29_v8 = vld [vmem:[%s2462_s0 + $0x8] sm:$0xff] }
   0x3   :  { %v58_v9 = vand.u32 4294901760, %v33_v5  ;;  %v43_v10 = vsel %vm25_vm0, %v28_v7, 0  ;;  %v46_v11 = vsel %vm25_vm0, %v29_v8, 0 }
   0x4   :  { %v2142_v12 = vpack.c.bf16 %v52_v4, %v49_v3  ;;  %v2144_v13 = vand.u32 4294901760, %v43_v10  ;;  %v2146_v14 = vand.u32 4294901760, %v46_v11  ;;  %v139_v15 = vsub.f32 %v30_v0, %v49_v3 }
   0x5   :  { %10 = vsyncpa [#allocation4], 0  ;;  %v2148_v16 = vpack.c.bf16 %v58_v9, %v55_v6  ;;  %v146_v17 = vsub.f32 %v31_v1, %v52_v4  ;;  %v153_v18 = vsub.f32 %v32_v2, %v55_v6  ;;  %v160_v19 = vsub.f32 %v33_v5, %v58_v9  ;;  %v632_v46 = vld [vmem:[%s2465_s3] sm:$0xff]  ;;  %v633_v47 = vld [vmem:[%s2465_s3 + $0x8] sm:$0xff]  ;;  %s2089_s10 = smov [#allocation3]  }
   0x6   :  { %1791 = vmatprep.subr.bf16.mxu0 %v2142_v12  ;;  %v118_v20 = vsub.f32 %v43_v10, %v2144_v13  ;;  %v128_v21 = vsub.f32 %v46_v11, %v2146_v14  ;;  %v140_v22 = vand.u32 4294901760, %v139_v15  ;;  %v649_v48 = vand.u32 4294901760, %v632_v46  ;;  %v634_v52 = vld [vmem:[%s2465_s3 + $0x10] sm:$0xff]  ;;  %v635_v53 = vld [vmem:[%s2465_s3 + $0x18] sm:$0xff]  ;;  %v636_v59 = vld [vmem:[%s2465_s3 + $0x20] sm:$0xff]  ;;  %s1357_s11 = sshll.u32 %s2089_s10, 4  ;;  %s1358_s11 = int_to_ptr.vmem [resolvable:$true] %s1357_s11 }
   0x7   :  { %1793 = vmatpush3.bf16.msra.mxu0 %v2142_v12  ;;  %v147_v23 = vand.u32 4294901760, %v146_v17  ;;  %v154_v24 = vand.u32 4294901760, %v153_v18  ;;  %v161_v25 = vand.u32 4294901760, %v160_v19  ;;  %v1806_v42 = vpack.c.bf16 %v146_v17, %v139_v15  ;;  %v637_v60 = vld [vmem:[%s2465_s3 + $0x28] sm:$0xff]  ;;  %v638_v3 = vld [vmem:[%s2465_s3 + $0x30] sm:$0xff]  ;;  %v639_v4 = vld [vmem:[%s2465_s3 + $0x38] sm:$0xff]  ;;  %p2069_p1 = scmp.lt.s32.totalorder %s1358_s11, %s1358_s11 }
   0x8   :  { %1795 = vmatprep.subr.bf16.mxu0 %v2148_v16  ;;  %v119_v26 = vand.u32 4294901760, %v118_v20  ;;  %v129_v27 = vand.u32 4294901760, %v128_v21  ;;  %v141_v28 = vsub.f32 %v139_v15, %v140_v22  ;;  %v1810_v43 = vpack.c.bf16 %v160_v19, %v153_v18  ;;  %v640_v11 = vld [vmem:[%s2465_s3 + $0x40] sm:$0xff]  ;;  %s2064_s12 = scalar_lea.vmem %s1358_s11, 256 }
   0x9   :  { %v148_v29 = vsub.f32 %v146_v17, %v147_v23  ;;  %v155_v30 = vsub.f32 %v153_v18, %v154_v24  ;;  %v162_v31 = vsub.f32 %v160_v19, %v161_v25  ;;  %v1822_v44 = vpack.c.bf16 %v147_v23, %v140_v22  ;;  %v642_v19 = vld [vmem:[%s2465_s3 + $0x50] sm:$0xff]  ;;  %p2065_p0 = scmp.ne.s32.totalorder %s1358_s11, %s2064_s12  ;;  %p2070_p2 = scmp.lt.s32.totalorder %s2064_s12, %s2064_s12 }
   0xa   :  { %v120_v32 = vsub.f32 %v118_v20, %v119_v26  ;;  %v130_v33 = vsub.f32 %v128_v21, %v129_v27  ;;  %v142_v34 = vand.u32 4294901760, %v141_v28  ;;  %v1826_v45 = vpack.c.bf16 %v161_v25, %v154_v24  ;;  %v645_v28 = vld [vmem:[%s2465_s3 + $0x68] sm:$0xff] }
   0xb   :  { %1797 = vmatpush3.bf16.msra.mxu0 %v2148_v16  ;;  %v149_v35 = vand.u32 4294901760, %v148_v29  ;;  %v156_v36 = vand.u32 4294901760, %v155_v30  ;;  %v163_v37 = vand.u32 4294901760, %v162_v31  ;;  %v652_v49 = vand.u32 4294901760, %v633_v47  ;;  %p2071_p3 = por %p2070_p2, %p2069_p1 }
   0xc   :  { %v121_v38 = vand.u32 4294901760, %v120_v32  ;;  %v131_v39 = vand.u32 4294901760, %v130_v33  ;;  %v2176_v50 = vsub.f32 %v632_v46, %v649_v48  ;;  %v655_v55 = vand.u32 4294901760, %v634_v52 }
   0xd   :  { %v1798_v40 = vpack.c.bf16 %v149_v35, %v142_v34  ;;  %v1802_v41 = vpack.c.bf16 %v163_v37, %v156_v36  ;;  %v2178_v51 = vsub.f32 %v633_v47, %v652_v49  ;;  %v658_v56 = vand.u32 4294901760, %v635_v53  ;;  %v646_v35 = vld [vmem:[%s2465_s3 + $0x70] sm:$0xff]  ;;  %v647_v36 = vld [vmem:[%s2465_s3 + $0x78] sm:$0xff]  ;;  %p2072_p4 = pnand %p2071_p3, %p2065_p0 }
   0xe   :  { %1522 = vmatprep.mubr.f32.mxu0 %v121_v38  ;;  %v2188_v57 = vsub.f32 %v634_v52, %v655_v55  ;;  %v661_v62 = vand.u32 4294901760, %v636_v59  ;;  %v664_v63 = vand.u32 4294901760, %v637_v60  ;;  %v2200_v0 = vpack.c.bf16 %v652_v49, %v649_v48 }
   0xf   :  { %1523 = vmatmul.mubr.f32.vlgmr.msra.gmra.mrb[0].mxu0 %v131_v39  ;;  %1799 = vmatprep.subr.bf16.mxu0 %v1798_v40  ;;  %v1902_v54 = vpack.c.bf16 %v2178_v51, %v2176_v50  ;;  %v2190_v58 = vsub.f32 %v635_v53, %v658_v56  ;;  %v667_v6 = vand.u32 4294901760, %v638_v3  ;;  %v670_v7 = vand.u32 4294901760, %v639_v4 }
  0x10   :  { %1801 = vmatpush3.bf16.msra.mxu0 %v1798_v40  ;;  %1533 = vmatprep.mubr.f32.mxu0 %v2144_v13  ;;  %v2202_v1 = vsub.f32 %v636_v59, %v661_v62  ;;  %v2204_v2 = vsub.f32 %v637_v60, %v664_v63  ;;  %v2216_v8 = vpack.c.bf16 %v658_v56, %v655_v55  ;;  %v679_v22 = vand.u32 4294901760, %v642_v19 }
  0x11   :  { %1803 = vmatprep.subr.bf16.mxu0 %v1802_v41  ;;  %1903 = vmatprep.subr.bf16.mxu1 %v1902_v54  ;;  %v1906_v61 = vpack.c.bf16 %v2190_v58, %v2188_v57  ;;  %v2218_v9 = vsub.f32 %v638_v3, %v667_v6  ;;  %v2220_v10 = vsub.f32 %v639_v4, %v670_v7  ;;  %v688_v31 = vand.u32 4294901760, %v645_v28 }
  0x12   :  { %1905 = vmatpush3.bf16.msra.mxu1 %v1902_v54  ;;  %v1910_v5 = vpack.c.bf16 %v2204_v2, %v2202_v1  ;;  %v2248_v24 = vpack.c.bf16 %v670_v7, %v667_v6  ;;  %v2250_v25 = vsub.f32 %v642_v19, %v679_v22  ;;  %v691_v38 = vand.u32 4294901760, %v646_v35 }
  0x13   :  { %1907 = vmatprep.subr.bf16.mxu1 %v1906_v61  ;;  %v2268_v34 = vsub.f32 %v645_v28, %v688_v31  ;;  %v694_v39 = vand.u32 4294901760, %v647_v36  ;;  %v752_v46 = vand.u32 4294901760, %v2176_v50  ;;  %v759_v47 = vand.u32 4294901760, %v2178_v51 }
  0x14   :  { %1805 = vmatpush3.bf16.msra.mxu0 %v1802_v41  ;;  %v2282_v41 = vsub.f32 %v646_v35, %v691_v38  ;;  %v766_v54 = vand.u32 4294901760, %v2188_v57  ;;  %v773_v55 = vand.u32 4294901760, %v2190_v58 }
  0x15   :  { %1807 = vmatprep.subr.bf16.mxu0 %v1806_v42  ;;  %v753_v48 = vsub.f32 %v2176_v50, %v752_v46  ;;  %v760_v49 = vsub.f32 %v2178_v51, %v759_v47  ;;  %v780_v51 = vand.u32 4294901760, %v2202_v1 }
  0x16   :  { %1909 = vmatpush3.bf16.msra.mxu1 %v1906_v61  ;;  %v767_v59 = vsub.f32 %v2188_v57, %v766_v54  ;;  %v774_v60 = vsub.f32 %v2190_v58, %v773_v55  ;;  %v794_v57 = vand.u32 4294901760, %v2218_v9  ;;  %v801_v58 = vand.u32 4294901760, %v2220_v10 }
  0x17   :  { %1534 = vmatmul.mubr.f32.vlgmr.msra.gmra.mrb[0].mxu0 %v2146_v14  ;;  %1911 = vmatprep.subr.bf16.mxu1 %v1910_v5  ;;  %v754_v52 = vand.u32 4294901760, %v753_v48  ;;  %v761_v53 = vand.u32 4294901760, %v760_v49  ;;  %v781_v3 = vsub.f32 %v2202_v1, %v780_v51  ;;  %v2346_v49 = vpack.c.bf16 %v759_v47, %v752_v46 }
  0x18   :  { %1809 = vmatpush3.bf16.msra.mxu0 %v1806_v42  ;;  %1544 = vmatprep.mubr.f32.mxu0 %v118_v20  ;;  %v643_v20 = vld [vmem:[%s2465_s3 + $0x58] sm:$0xff]  ;;  %v2284_v42 = vsub.f32 %v647_v36, %v694_v39  ;;  %v768_v61 = vand.u32 4294901760, %v767_v59  ;;  %v775_v50 = vand.u32 4294901760, %v774_v60  ;;  %v2354_v60 = vpack.c.bf16 %v801_v58, %v794_v57 }
  0x19   :  { %1811 = vmatprep.subr.bf16.mxu0 %v1810_v43  ;;  %v682_v23 = vand.u32 4294901760, %v643_v20  ;;  %v2305_v56 = vpack.c.bf16 %v761_v53, %v754_v52 }
  0x1a   :  { %1913 = vmatpush3.bf16.msra.mxu1 %v1910_v5  ;;  %v782_v5 = vand.u32 4294901760, %v781_v3 }
  0x1b   :  { %v2280_v40 = vpack.c.bf16 %v682_v23, %v679_v22 }
  0x1c   :  { %1813 = vmatpush3.bf16.msra.mxu0 %v1810_v43  ;;  %v1930_v43 = vpack.c.bf16 %v2284_v42, %v2282_v41 }
  0x1d   :  { %1815 = vmatprep.subr.bf16.mxu0 %v2142_v12 }
  0x1f   :  { %1545 = vmatmul.mubr.f32.vlgmr.msra.gmra.mrb[0].mxu0 %v128_v21 }
  0x20   :  { %1817 = vmatpush3.bf16.msra.mxu0 %v2142_v12  ;;  %1555 = vmatprep.mubr.f32.mxu0 %v119_v26  ;;  %v2252_v26 = vsub.f32 %v643_v20, %v682_v23  ;;  %v822_v23 = vand.u32 4294901760, %v2250_v25 }
  0x21   :  { %1819 = vmatprep.subr.bf16.mxu0 %v2148_v16 }
  0x22   :  { %v1922_v29 = vpack.c.bf16 %v2252_v26, %v2250_v25 }
  0x24   :  { %1821 = vmatpush3.bf16.msra.mxu0 %v2148_v16 }
  0x25   :  { %1823 = vmatprep.subr.bf16.mxu0 %v1822_v44 }
  0x27   :  { %1556 = vmatmul.mubr.f32.vlgmr.msra.gmra.mrb[0].mxu0 %v129_v27  ;;  %v644_v27 = vld [vmem:[%s2465_s3 + $0x60] sm:$0xff] }
  0x28   :  { %1825 = vmatpush3.bf16.msra.mxu0 %v1822_v44  ;;  %1566 = vmatprep.mubr.f32.mxu0 %v2144_v13  ;;  %v685_v30 = vand.u32 4294901760, %v644_v27 }
  0x29   :  { %1827 = vmatprep.subr.bf16.mxu0 %v1826_v45 }
  0x2a   :  { %v2266_v33 = vsub.f32 %v644_v27, %v685_v30  ;;  %v2290_v44 = vpack.c.bf16 %v688_v31, %v685_v30 }
  0x2c   :  { %1829 = vmatpush3.bf16.msra.mxu0 %v1826_v45  ;;  %v1926_v37 = vpack.c.bf16 %v2268_v34, %v2266_v33  ;;  %v2292_v45 = vpack.c.bf16 %v694_v39, %v691_v38  ;;  %v836_v31 = vand.u32 4294901760, %v2266_v33  ;;  %v850_v39 = vand.u32 4294901760, %v2282_v41 }
  0x2d   :  { %1831 = vmatprep.subr.bf16.mxu0 %v2142_v12 }
  0x2f   :  { %1567 = vmatmul.mubr.f32.vlgmr.msra.gmra.mrb[0].mxu0 %v2146_v14 }
  0x30   :  { %1833 = vmatpush3.bf16.msra.mxu0 %v2142_v12  ;;  %1577 = vmatprep.mubr.f32.mxu0 %v2144_v13  ;;  %v641_v12 = vld [vmem:[%s2465_s3 + $0x48] sm:$0xff]  ;;  %v1914_v13 = vpack.c.bf16 %v2220_v10, %v2218_v9 }
  0x31   :  { %1835 = vmatprep.subr.bf16.mxu0 %v2148_v16  ;;  %v676_v15 = vand.u32 4294901760, %v641_v12 }
  0x32   :  { %1915 = vmatprep.subr.bf16.mxu1 %v1914_v13 }
  0x33   :  { %v2236_v18 = vsub.f32 %v641_v12, %v676_v15  ;;  %1917 = vmatpush3.bf16.msra.mxu1 %v1914_v13  ;;  %v802_v12 = vsub.f32 %v2220_v10, %v801_v58  ;;  %v823_v10 = vsub.f32 %v2250_v25, %v822_v23  ;;  %v857_v25 = vand.u32 4294901760, %v2284_v42 }
  0x34   :  { %1837 = vmatpush3.bf16.msra.mxu0 %v2148_v16  ;;  %v2232_v16 = vpack.c.bf16 %v664_v63, %v661_v62  ;;  %v787_v62 = vand.u32 4294901760, %v2204_v2  ;;  %v2312_v63 = vpack.c.bf16 %v775_v50, %v768_v61 }
  0x35   :  { %1839 = vmatprep.subr.bf16.mxu0 %v2200_v0  ;;  %v815_v1 = vand.u32 4294901760, %v2236_v18  ;;  %v858_v48 = vsub.f32 %v2284_v42, %v857_v25  ;;  %v1368_v42 = vld [vmem:[%s2464_s2] ss:$0 sm:$0xff] }
  0x36   :  { %v788_v4 = vsub.f32 %v2204_v2, %v787_v62 }
  0x37   :  { %1578 = vmatmul.mubr.f32.vlgmr.msra.gmra.mrb[0].mxu0 %v2146_v14  ;;  %v673_v14 = vand.u32 4294901760, %v640_v11  ;;  %v816_v20 = vsub.f32 %v2236_v18, %v815_v1  ;;  %v859_v53 = vand.u32 4294901760, %v858_v48 }
  0x38   :  { %1841 = vmatpush3.bf16.msra.mxu0 %v2200_v0  ;;  %v789_v6 = vand.u32 4294901760, %v788_v4 }
  0x39   :  { %1843 = vmatprep.subr.bf16.mxu0 %v2216_v8  ;;  %v2234_v17 = vsub.f32 %v640_v11, %v673_v14  ;;  %v2264_v32 = vpack.c.bf16 %v676_v15, %v673_v14  ;;  %v795_v11 = vsub.f32 %v2218_v9, %v794_v57  ;;  %v803_v14 = vand.u32 4294901760, %v802_v12 }
  0x3a   :  { %v2318_v7 = vpack.c.bf16 %v789_v6, %v782_v5  ;;  %v817_v22 = vand.u32 4294901760, %v816_v20  ;;  %v829_v9 = vand.u32 4294901760, %v2252_v26 }
  0x3b   :  { %v1918_v21 = vpack.c.bf16 %v2236_v18, %v2234_v17  ;;  %v796_v13 = vand.u32 4294901760, %v795_v11  ;;  %v808_v15 = vand.u32 4294901760, %v2234_v17  ;;  %v837_v18 = vsub.f32 %v2266_v33, %v836_v31 }
  0x3c   :  { %1845 = vmatpush3.bf16.msra.mxu0 %v2216_v8  ;;  %v830_v28 = vsub.f32 %v2252_v26, %v829_v9  ;;  %v851_v26 = vsub.f32 %v2282_v41, %v850_v39  ;;  %v2350_v33 = vpack.c.bf16 %v773_v55, %v766_v54  ;;  %v2358_v50 = vpack.c.bf16 %v829_v9, %v822_v23 }
  0x3d   :  { %1847 = vmatprep.subr.bf16.mxu0 %v2232_v16  ;;  %1919 = vmatprep.subr.bf16.mxu1 %v1918_v21  ;;  %v2324_v19 = vpack.c.bf16 %v803_v14, %v796_v13  ;;  %v809_v2 = vsub.f32 %v2234_v17, %v808_v15  ;;  %v843_v17 = vand.u32 4294901760, %v2268_v34  ;;  %v2356_v61 = vpack.c.bf16 %v815_v1, %v808_v15 }
  0x3e   :  { %1921 = vmatpush3.bf16.msra.mxu1 %v1918_v21  ;;  %v831_v30 = vand.u32 4294901760, %v830_v28  ;;  %v852_v52 = vand.u32 4294901760, %v851_v26  ;;  %v2362_v41 = vpack.c.bf16 %v857_v25, %v850_v39 }
  0x3f   :  { %1923 = vmatprep.subr.bf16.mxu1 %v1922_v29  ;;  %v810_v21 = vand.u32 4294901760, %v809_v2  ;;  %v844_v36 = vsub.f32 %v2268_v34, %v843_v17  ;;  %v2352_v34 = vpack.c.bf16 %v787_v62, %v780_v51  ;;  %v2360_v3 = vpack.c.bf16 %v843_v17, %v836_v31 }
  0x40   :  { %1849 = vmatpush3.bf16.msra.mxu0 %v2232_v16  ;;  %v2348_v59 = vpack.c.bf16 %v859_v53, %v852_v52 }
  0x41   :  { %1851 = vmatprep.subr.bf16.mxu0 %v2248_v24  ;;  %v2330_v27 = vpack.c.bf16 %v817_v22, %v810_v21  ;;  %v845_v38 = vand.u32 4294901760, %v844_v36 }
  0x42   :  { %1925 = vmatpush3.bf16.msra.mxu1 %v1922_v29  ;;  %v824_v29 = vand.u32 4294901760, %v823_v10 }
  0x43   :  { %1927 = vmatprep.subr.bf16.mxu1 %v1926_v37 }
  0x44   :  { %1853 = vmatpush3.bf16.msra.mxu0 %v2248_v24  ;;  %v2336_v35 = vpack.c.bf16 %v831_v30, %v824_v29 }
  0x45   :  { %1855 = vmatprep.subr.bf16.mxu0 %v2264_v32 }
  0x46   :  { %1929 = vmatpush3.bf16.msra.mxu1 %v1926_v37  ;;  %v838_v37 = vand.u32 4294901760, %v837_v18 }
  0x47   :  { %1931 = vmatprep.subr.bf16.mxu1 %v1930_v43 }
  0x48   :  { %1857 = vmatpush3.bf16.msra.mxu0 %v2264_v32 }
  0x49   :  { %1859 = vmatprep.subr.bf16.mxu0 %v2280_v40 }
  0x4a   :  { %1933 = vmatpush3.bf16.msra.mxu1 %v1930_v43  ;;  %v2342_v43 = vpack.c.bf16 %v845_v38, %v838_v37 }
  0x4b   :  { %1935 = vmatprep.subr.bf16.mxu1 %v2200_v0 }
  0x4c   :  { %1861 = vmatpush3.bf16.msra.mxu0 %v2280_v40 }
  0x4d   :  { %1863 = vmatprep.subr.bf16.mxu0 %v2290_v44 }
  0x50   :  { %1865 = vmatpush3.bf16.msra.mxu0 %v2290_v44 }
  0x51   :  { %1867 = vmatprep.subr.bf16.mxu0 %v2292_v45 }
  0x54   :  { %1869 = vmatpush3.bf16.msra.mxu0 %v2292_v45 }
  0x55   :  { %1871 = vmatprep.subr.bf16.mxu0 %v2305_v56 }
 0x10a   :  { %v1579_v46 = vpop.f32.mrb[0].mxu0 }
 0x10b   :  { %v2030_v47 = vadd.f32 %v1579_v46, %v1368_v42  ;;  %v566_v54 = vpop.f32.mrb[1].mxu0 }
 0x10c   :  { %v2031_v55 = vadd.f32 %v1368_v42, %v566_v54 }
 0x10d   :  { %v579_v51 = vmul.f32 0.70710677, %v2030_v47 }
 0x10e   :  { %v578_v62 = vmul.f32 0.70710677, %v2031_v55 }
 0x10f   :  { %v581_v4 = vand.u32 2147483647, %v579_v51  ;;  %vm621_vm1 = vcmp.ge.f32.partialorder %v579_v51, 0.0 }
 0x110   :  { %v580_v5 = vand.u32 2147483647, %v578_v62  ;;  %vm620_vm2 = vcmp.ge.f32.partialorder %v578_v62, 0.0 }
 0x111   :  { %v583_v6 = vmul.f32 0.3275911, %v581_v4  ;;  %v609_v12 = vsub.f32 0.0, %v581_v4 }
 0x112   :  { %v582_v57 = vmul.f32 0.3275911, %v580_v5  ;;  %v608_v13 = vsub.f32 0.0, %v580_v5 }
 0x113   :  { %v585_v58 = vadd.f32 1.0, %v583_v6  ;;  %v611_v15 = vmul.f32 %v609_v12, %v581_v4 }
 0x114   :  { %v584_v11 = vadd.f32 1.0, %v582_v57  ;;  %v610_v20 = vmul.f32 %v608_v13, %v580_v5 }
 0x115   :  { %2056 = vrcp.f32 %v585_v58  ;;  %v614_v23 = vmul.f32 1.442695, %v611_v15  ;;  %v576_v15 = vmul.f32 0.5, %v2031_v55 }
 0x116   :  { %2058 = vrcp.f32 %v584_v11  ;;  %v612_v28 = vmul.f32 1.442695, %v610_v20  ;;  %v577_v11 = vmul.f32 0.5, %v2030_v47 }
 0x117   :  { %2060 = vpow2.f32 %v614_v23 }
 0x118   :  { %2062 = vpow2.f32 %v612_v28 }
 0x11f   :  { %v2057_v14 = vpop.eup %2056 }
 0x120   :  { %v2059_v1 = vpop.eup %2058  ;;  %v591_v2 = vmul.f32 1.0614054, %v2057_v14 }
 0x121   :  { %v590_v21 = vmul.f32 1.0614054, %v2059_v1  ;;  %v2061_v52 = vpop.eup %2060 }
 0x122   :  { %v593_v22 = vadd.f32 -1.4531521, %v591_v2  ;;  %v2063_v42 = vpop.eup %2062 }
 0x123   :  { %v592_v9 = vadd.f32 -1.4531521, %v590_v21 }
 0x124   :  { %v595_v10 = vmul.f32 %v2057_v14, %v593_v22 }
 0x125   :  { %v594_v29 = vmul.f32 %v2059_v1, %v592_v9 }
 0x126   :  { %v597_v30 = vadd.f32 1.4214138, %v595_v10 }
 0x127   :  { %v596_v31 = vadd.f32 1.4214138, %v594_v29 }
 0x128   :  { %v599_v17 = vmul.f32 %v2057_v14, %v597_v30 }
 0x129   :  { %v598_v18 = vmul.f32 %v2059_v1, %v596_v31 }
 0x12a   :  { %v601_v36 = vadd.f32 -0.28449672, %v599_v17 }
 0x12b   :  { %v600_v37 = vadd.f32 -0.28449672, %v598_v18 }
 0x12c   :  { %v603_v38 = vmul.f32 %v2057_v14, %v601_v36 }
 0x12d   :  { %v602_v39 = vmul.f32 %v2059_v1, %v600_v37 }
 0x12e   :  { %v605_v25 = vadd.f32 0.2548296, %v603_v38 }
 0x12f   :  { %v604_v26 = vadd.f32 0.2548296, %v602_v39 }
 0x130   :  { %v607_v48 = vmul.f32 %v2057_v14, %v605_v25 }
 0x131   :  { %v606_v53 = vmul.f32 %v2059_v1, %v604_v26 }
 0x132   :  { %v617_v46 = vmul.f32 %v2061_v52, %v607_v48 }
 0x133   :  { %v616_v54 = vmul.f32 %v2063_v42, %v606_v53 }
 0x134   :  { %v619_v4 = vsub.f32 1.0, %v617_v46 }
 0x135   :  { %v618_v5 = vsub.f32 1.0, %v616_v54 }
 0x136   :  { %v623_v6 = vsub.f32 0.0, %v619_v4 }
 0x137   :  { %v622_v57 = vsub.f32 0.0, %v618_v5 }
 0x138   :  { %v625_v58 = vsel %vm621_vm1, %v619_v4, %v623_v6 }
 0x139   :  { %v627_v12 = vadd.f32 1.0, %v625_v58  ;;  %v624_v13 = vsel %vm620_vm2, %v618_v5, %v622_v57 }
 0x13a   :  { %v626_v2 = vadd.f32 1.0, %v624_v13 }
 0x13b   :  { %v629_v20 = vmul.f32 %v627_v12, %v577_v11 }
 0x13c   :  { %v628_v21 = vmul.f32 %v626_v2, %v576_v15 }
 0x13d   :  { %v2367_v14 = vand.u32 4294901760, %v629_v20 }
 0x13e   :  { %v2369_v1 = vand.u32 4294901760, %v628_v21 }
 0x13f   :  { %v740_v22 = vsub.f32 %v629_v20, %v2367_v14 }
 0x140   :  { %v730_v23 = vsub.f32 %v628_v21, %v2369_v1 }
 0x141   :  { %v741_v9 = vand.u32 4294901760, %v740_v22 }
 0x142   :  { %1682 = vmatprep.mubr.f32.mxu1 %v730_v23  ;;  %v731_v51 = vand.u32 4294901760, %v730_v23 }
 0x143   :  { %1683 = vmatmul.mubr.f32.vlgmr.msra.gmra.mrb[0].mxu1 %v740_v22  ;;  %v742_v62 = vsub.f32 %v740_v22, %v741_v9 }
 0x144   :  { %1937 = vmatpush3.bf16.msra.mxu1 %v2200_v0  ;;  %1717 = vmatprep.mubr.f32.mxu1 %v731_v51  ;;  %v732_v47 = vsub.f32 %v730_v23, %v731_v51 }
 0x145   :  { %1939 = vmatprep.subr.bf16.mxu1 %v2216_v8  ;;  %v743_v10 = vand.u32 4294901760, %v742_v62 }
 0x146   :  { %v733_v55 = vand.u32 4294901760, %v732_v47 }
 0x148   :  { %1941 = vmatpush3.bf16.msra.mxu1 %v2216_v8  ;;  %1612 = vmatprep.mubr.f32.mxu0 %v733_v55 }
 0x149   :  { %1613 = vmatmul.mubr.f32.vlgmr.msra.gmra.mrb[2].mxu0 %v743_v10  ;;  %1943 = vmatprep.subr.bf16.mxu1 %v2232_v16 }
 0x14a   :  { %1873 = vmatpush3.bf16.msra.mxu0 %v2305_v56  ;;  %1647 = vmatprep.mubr.f32.mxu0 %v2369_v1 }
 0x14b   :  { %1875 = vmatprep.subr.bf16.mxu0 %v2312_v63 }
 0x14c   :  { %1945 = vmatpush3.bf16.msra.mxu1 %v2232_v16 }
 0x14d   :  { %1947 = vmatprep.subr.bf16.mxu1 %v2248_v24 }
 0x14e   :  { %1877 = vmatpush3.bf16.msra.mxu0 %v2312_v63 }
 0x14f   :  { %1879 = vmatprep.subr.bf16.mxu0 %v2318_v7 }
 0x150   :  { %1949 = vmatpush3.bf16.msra.mxu1 %v2248_v24 }
 0x151   :  { %1951 = vmatprep.subr.bf16.mxu1 %v2264_v32 }
 0x152   :  { %1881 = vmatpush3.bf16.msra.mxu0 %v2318_v7 }
 0x153   :  { %1883 = vmatprep.subr.bf16.mxu0 %v2324_v19 }
 0x154   :  { %1953 = vmatpush3.bf16.msra.mxu1 %v2264_v32 }
 0x155   :  { %1955 = vmatprep.subr.bf16.mxu1 %v2280_v40 }
 0x156   :  { %1885 = vmatpush3.bf16.msra.mxu0 %v2324_v19 }
 0x157   :  { %1887 = vmatprep.subr.bf16.mxu0 %v2330_v27 }
 0x158   :  { %1957 = vmatpush3.bf16.msra.mxu1 %v2280_v40 }
 0x159   :  { %1959 = vmatprep.subr.bf16.mxu1 %v2290_v44 }
 0x15a   :  { %1889 = vmatpush3.bf16.msra.mxu0 %v2330_v27 }
 0x15b   :  { %1891 = vmatprep.subr.bf16.mxu0 %v2336_v35 }
 0x15c   :  { %1961 = vmatpush3.bf16.msra.mxu1 %v2290_v44 }
 0x15d   :  { %1963 = vmatprep.subr.bf16.mxu1 %v2292_v45 }
 0x15e   :  { %1893 = vmatpush3.bf16.msra.mxu0 %v2336_v35 }
 0x15f   :  { %1895 = vmatprep.subr.bf16.mxu0 %v2342_v43 }
 0x160   :  { %1965 = vmatpush3.bf16.msra.mxu1 %v2292_v45 }
 0x161   :  { %1967 = vmatprep.subr.bf16.mxu1 %v2346_v49 }
 0x162   :  { %1897 = vmatpush3.bf16.msra.mxu0 %v2342_v43 }
 0x163   :  { %1718 = vmatmul.mubr.f32.vlgmr.msra.gmra.mrb[0].mxu1 %v741_v9  ;;  %1899 = vmatprep.subr.bf16.mxu0 %v2348_v59 }
 0x164   :  { %1969 = vmatpush3.bf16.msra.mxu1 %v2346_v49  ;;  %1752 = vmatprep.mubr.f32.mxu1 %v2369_v1 }
 0x165   :  { %1971 = vmatprep.subr.bf16.mxu1 %v2350_v33 }
 0x166   :  { %1901 = vmatpush3.bf16.msra.mxu0 %v2348_v59 }
 0x168   :  { %1973 = vmatpush3.bf16.msra.mxu1 %v2350_v33 }
 0x169   :  { %1648 = vmatmul.mubr.f32.vlgmr.msra.gmra.mrb[2].mxu0 %v2367_v14  ;;  %1975 = vmatprep.subr.bf16.mxu1 %v2352_v34 }
 0x16c   :  { %1977 = vmatpush3.bf16.msra.mxu1 %v2352_v34 }
 0x16d   :  { %1979 = vmatprep.subr.bf16.mxu1 %v2354_v60 }
 0x170   :  { %1981 = vmatpush3.bf16.msra.mxu1 %v2354_v60 }
 0x171   :  { %1983 = vmatprep.subr.bf16.mxu1 %v2356_v61 }
 0x174   :  { %1985 = vmatpush3.bf16.msra.mxu1 %v2356_v61 }
 0x175   :  { %1987 = vmatprep.subr.bf16.mxu1 %v2358_v50 }
 0x178   :  { %1989 = vmatpush3.bf16.msra.mxu1 %v2358_v50 }
 0x179   :  { %1991 = vmatprep.subr.bf16.mxu1 %v2360_v3 }
 0x17c   :  { %1993 = vmatpush3.bf16.msra.mxu1 %v2360_v3 }
 0x17d   :  { %1995 = vmatprep.subr.bf16.mxu1 %v2362_v41 }
 0x180   :  { %1997 = vmatpush3.bf16.msra.mxu1 %v2362_v41 }
 0x181   :  { %1999 = vmatprep.subr.bf16.mxu1 %v2200_v0 }
 0x183   :  { %1753 = vmatmul.mubr.f32.vlgmr.msra.gmra.mrb[0].mxu1 %v2367_v14 }
 0x184   :  { %2001 = vmatpush3.bf16.msra.mxu1 %v2200_v0  ;;  %1787 = vmatprep.mubr.f32.mxu1 %v2369_v1  ;;  %v2088_v0 = vmov 0.0  }
 0x185   :  { %2003 = vmatprep.subr.bf16.mxu1 %v2216_v8  ;;  %27 = vst.msk [vmem:[#allocation2 + $0x8] sm:$0xff] %vm25_vm0, %v2088_v0  ;;  %26 = vst.msk [vmem:[#allocation2] sm:$0xff] %vm25_vm0, %v2088_v0 }
 0x188   :  { %2005 = vmatpush3.bf16.msra.mxu1 %v2216_v8 }
 0x189   :  { %2007 = vmatprep.subr.bf16.mxu1 %v2232_v16 }
 0x18c   :  { %2009 = vmatpush3.bf16.msra.mxu1 %v2232_v16  ;;  %v630_v56 = vld [vmem:[#allocation2] sm:$0xff] }
 0x18d   :  { %2011 = vmatprep.subr.bf16.mxu1 %v2248_v24 }
 0x190   :  { %2013 = vmatpush3.bf16.msra.mxu1 %v2248_v24  ;;  %v631_v24 = vld [vmem:[#allocation2 + $0x8] sm:$0xff] }
 0x191   :  { %2015 = vmatprep.subr.bf16.mxu1 %v2264_v32 }
 0x194   :  { %2017 = vmatpush3.bf16.msra.mxu1 %v2264_v32 }
 0x195   :  { %2019 = vmatprep.subr.bf16.mxu1 %v2280_v40 }
 0x198   :  { %2021 = vmatpush3.bf16.msra.mxu1 %v2280_v40 }
 0x199   :  { %2023 = vmatprep.subr.bf16.mxu1 %v2290_v44 }
 0x19c   :  { %2025 = vmatpush3.bf16.msra.mxu1 %v2290_v44 }
 0x19d   :  { %2027 = vmatprep.subr.bf16.mxu1 %v2292_v45 }
 0x1a0   :  { %2029 = vmatpush3.bf16.msra.mxu1 %v2292_v45  ;;  %v1369_v45 = vld [vmem:[%s2466_s4] ss:$0 sm:$0xff] }
 0x1a3   :  { %1788 = vmatmul.mubr.f32.vlgmr.msra.gmra.mrb[0].mxu1 %v2367_v14 }
 0x23c   :  { %v1649_v8 = vpop.f32.mrb[2].mxu0 }
 0x23d   :  { %v896_v16 = vpop.f32.mrb[3].mxu0 }
 0x276   :  { %v1789_v32 = vpop.f32.mrb[0].mxu1 }
 0x277   :  { %v2032_v40 = vadd.f32 %v1789_v32, %v1649_v8  ;;  %v1322_v63 = vpop.f32.mrb[1].mxu1 }
 0x278   :  { %v2033_v7 = vadd.f32 %v1322_v63, %v896_v16 }
 0x279   :  { %v1333_v44 = vadd.f32 %v2032_v40, %v631_v24 }
 0x27a   :  { %v1332_v19 = vadd.f32 %v2033_v7, %v630_v56 }
 0x27b   :  { %1335 = vst.msk [vmem:[#allocation2 + $0x8] sm:$0xff] %vm25_vm0, %v1333_v44 }
 0x27c   :  { %1334 = vst.msk [vmem:[#allocation2] sm:$0xff] %vm25_vm0, %v1332_v19 }
 0x282   :  { %v1340_v27 = vld [vmem:[#allocation2 + $0x8] sm:$0xff] }
 0x283   :  { %v1339_v35 = vld [vmem:[#allocation2] sm:$0xff]  ;;  %v1349_v43 = vadd.f32 %v1369_v45, %v1340_v27 }
 0x284   :  { %v1348_v49 = vadd.f32 %v1369_v45, %v1339_v35 }
 0x285   :  { %1351 = vst.msk [vmem:[#allocation3 + $0x8] sm:$0xff] %vm25_vm0, %v1349_v43 }
 0x286   :  { %1350 = vst.msk [vmem:[#allocation3] sm:$0xff] %vm25_vm0, %v1348_v49 }
 0x287   :  { %2075 = shalt.err (!%p2072_p4)
}
 0x288   :  { %s2076_s14 = scalar_lea.hbm %s2467_s5, 256 }
 0x289   :  { %p2077_p5 = scmp.ne.s32.totalorder %s2467_s5, %s2076_s14  ;;  %p2080_p6 = scmp.lt.u32.totalorder %s2076_s14, %s2467_s5 }
 0x28b   :  { %p2082_p7 = pnand %p2080_p6, %p2077_p5 }
 0x28d   :  { %2085 = shalt.err (!%p2082_p7)
}
 0x28e   :  { %s2090_s19 = smov 128   ;;  %s2091_s20 = smov 8  }
 0x28f   :  { %1363 = dma.vmem_to_hbm [thread:$0]  %s1358_s11, 256, %s2467_s5, [#allocation4], %s2090_s19, %s2090_s19, %s2091_s20  }
 0x290   :  { %2086 = dma.done.wait [#allocation4], 256  }
 0x291   :  { %2087 = vsyncadd [#allocation4], 4294967040 }
 0x292   :  { %1367 = vsyncpa [#allocation4], 1 }

</bundles_post_ra>
